<compile_context>
chip_gen: v7x
topology: tpu7x:2x2x1
jax: 0.10.0
libtpu: 0.0.40
codegen_flags: <defaults>
</compile_context>

<pallas_src>
import functools
from math import sqrt

import jax
import jax.numpy as jnp
from jax.experimental import pallas as pl
from jax.experimental.pallas import tpu as pltpu


def _encoder_kernel(x_hbm, wqkv_ref, wo_ref, o_ref, *, tb, L, Dp, tq):
    """One grid step == one encoder layer applied to one batch shard.

    x_hbm   : (B, L, Dp)    input activations, left in HBM (memory_space=ANY)
    wqkv_ref: (1, Dp, 3*Dp) fused (scaled-Q | K | V) projection, bf16
    wo_ref  : (1, Dp, Dp)   output projection, bf16
    o_ref   : (tb, L, Dp)   resident f32 activation buffer / final output
    """
    b = pl.program_id(0)
    layer = pl.program_id(1)

    # Seed the resident activation buffer once per batch shard with a single
    # DMA straight from HBM; x never occupies a second double-buffered VMEM
    # block for the rest of the grid.
    @pl.when(layer == 0)
    def _():
        start = pl.multiple_of(b * tb, tb)
        pltpu.sync_copy(x_hbm.at[pl.ds(start, tb)], o_ref)

    x = o_ref[...]                              # (tb, L, Dp) f32 residual stream
    x2 = x.reshape(tb * L, Dp)

    wqkv = wqkv_ref[0]                          # (Dp, 3Dp) bf16 -> MXU as-is
    wo = wo_ref[0]                              # (Dp, Dp)  bf16

    # Fused Q/K/V projection: bf16 operands, f32 accumulation on the MXU.
    qkv = jnp.dot(x2.astype(wqkv.dtype), wqkv,
                  preferred_element_type=jnp.float32)        # (tb*L, 3Dp)
    qkv = qkv.reshape(tb, L, 3 * Dp)
    # 128-aligned column slices (Dp is a multiple of 128); scale is already
    # folded into the Q weights.
    q = qkv[:, :, 0 * Dp:1 * Dp].astype(jnp.bfloat16)
    k = qkv[:, :, 1 * Dp:2 * Dp].astype(jnp.bfloat16)
    v = qkv[:, :, 2 * Dp:3 * Dp].astype(jnp.bfloat16)

    # Attention tiled over query blocks: only a (tb, tq, L) score slab is live
    # at a time.  Softmax is over the full key axis (k, v are fully resident),
    # so it stays exact -> no online-softmax rescaling needed.  Static unroll
    # keeps every slice compile-time aligned.
    for t in range(L // tq):
        sl = slice(t * tq, (t + 1) * tq)
        s = jnp.einsum("bqd,bkd->bqk", q[:, sl, :], k,
                       preferred_element_type=jnp.float32)    # (tb, tq, L)
        m = jnp.max(s, axis=-1, keepdims=True)
        p = jnp.exp(s - m)
        p = p * pl.reciprocal(jnp.sum(p, axis=-1, keepdims=True), approx=True)
        ctx = jnp.einsum("bqk,bkd->bqd", p.astype(jnp.bfloat16), v,
                         preferred_element_type=jnp.float32)  # (tb, tq, Dp)
        out_t = jnp.dot(ctx.reshape(tb * tq, Dp).astype(wo.dtype), wo,
                        preferred_element_type=jnp.float32).reshape(tb, tq, Dp)
        # Residual in f32; the result stays resident for the next layer.
        o_ref[:, sl, :] = (x[:, sl, :] + out_t).astype(o_ref.dtype)


def _pad_to(a, axis, size):
    pad = size - a.shape[axis]
    if pad <= 0:
        return a
    widths = [(0, 0)] * a.ndim
    widths[axis] = (0, pad)
    return jnp.pad(a, widths)


def _vmem_limit_bytes(tb, L, Dp, tq):
    f32, bf16 = 4, 2
    act = tb * L * Dp * f32                      # resident output block
    qkv = tb * L * 4 * Dp * f32                  # x value + fused qkv temporaries
    w = 2 * (Dp * 3 * Dp + Dp * Dp) * bf16       # double-buffered bf16 weights
    attn = tb * tq * (2 * L + 2 * Dp) * f32      # score/prob slab + ctx/out tile
    est = 2 * act + qkv + w + attn
    # Generous margin for compiler-internal scratch, capped under v7x's 64 MiB
    # physical VMEM; raise further on v5e/v6e (128 MiB) for big shapes.
    return int(min(max(4 * est, 16 << 20), 48 << 20))


def complex_encoder(x, wqkv_stack, wo_stack, *, batch_block=None, query_block=None):
    """ComplexEncoder.forward: all attention layers fused into one pallas_call.

    x          : (B, L, D)           input activations
    wqkv_stack : (num_layers, D, 3D) concatenated Q/K/V weights per layer
    wo_stack   : (num_layers, D, D)  output projection per layer
    """
    B, L, D = x.shape
    num_layers = wqkv_stack.shape[0]

    tb = B if batch_block is None else batch_block
    assert B % tb == 0, "batch_block must divide the batch size"
    tq = L if query_block is None else min(query_block, L)
    assert L % tq == 0, "query_block must divide the sequence length"

    # ---- one-time call-site weight prep (outside the kernel) --------------
    # Fold the 1/sqrt(D) attention scale into the Q columns of the fused
    # projection: removes a full (B, L, L) VPU multiply per layer.
    scale = 1.0 / sqrt(D)
    wq = wqkv_stack[:, :, 0 * D:1 * D] * scale
    wk = wqkv_stack[:, :, 1 * D:2 * D]
    wv = wqkv_stack[:, :, 2 * D:3 * D]

    # Pad the model dim up to a lane-dense multiple of 128 with zero rows/cols.
    # Padded features stay exactly zero through every layer, so the sliced
    # result equals the unpadded math.
    Dp = max(128, -(-D // 128) * 128)
    wq, wk, wv = [_pad_to(_pad_to(w_, 1, Dp), 2, Dp) for w_ in (wq, wk, wv)]
    wqkv_p = jnp.concatenate([wq, wk, wv], axis=-1).astype(jnp.bfloat16)
    wo_p = _pad_to(_pad_to(wo_stack, 1, Dp), 2, Dp).astype(jnp.bfloat16)
    # Residual stream stays f32 so bf16 rounding does not compound per layer.
    x_p = _pad_to(x.astype(jnp.float32), 2, Dp)

    kernel = functools.partial(_encoder_kernel, tb=tb, L=L, Dp=Dp, tq=tq)

    out_p = pl.pallas_call(
        kernel,
        out_shape=jax.ShapeDtypeStruct((B, L, Dp), jnp.float32),
        grid_spec=pltpu.PrefetchScalarGridSpec(
            num_scalar_prefetch=0,
            grid=(B // tb, num_layers),         # (parallel batch shards, layers)
            in_specs=[
                # x: left in HBM; DMA'd once per batch shard at layer 0 only.
                pl.BlockSpec(memory_space=pl.ANY),
                # Per-layer bf16 weights: indexed by the layer axis, default
                # double-buffering prefetches layer l+1 while l computes.
                # TODO(synk): on v5e with small B*L (weight-streaming bound),
                # raise the depth via pipeline_mode=pl.Buffered(3).
                pl.BlockSpec((1, Dp, 3 * Dp), lambda b, l: (l, 0, 0)),
                pl.BlockSpec((1, Dp, Dp), lambda b, l: (l, 0, 0)),
            ],
            # Constant block index across the layer axis -> activations stay
            # resident in VMEM for all layers of a shard; one HBM writeback.
            out_specs=pl.BlockSpec((tb, L, Dp), lambda b, l: (b, 0, 0)),
        ),
        compiler_params=pltpu.CompilerParams(
            # Batch shards are independent -> "parallel" (megacore sharding on
            # v7x); layers are sequentially dependent -> "arbitrary".
            dimension_semantics=("parallel", "arbitrary"),
            vmem_limit_bytes=_vmem_limit_bytes(tb, L, Dp, tq),
        ),
    )(x_p, wqkv_p, wo_p)

    return out_p[:, :, :D].astype(x.dtype)


def init_layer_params(key, num_layers, d_model):
    """Deterministic synthetic weights (Xavier-ish scaling), stacked per layer."""
    s = 1.0 / sqrt(d_model)
    kq, kk, kv, ko = jax.random.split(key, 4)
    wq = jax.random.normal(kq, (num_layers, d_model, d_model), jnp.float32) * s
    wk = jax.random.normal(kk, (num_layers, d_model, d_model), jnp.float32) * s
    wv = jax.random.normal(kv, (num_layers, d_model, d_model), jnp.float32) * s
    wo = jax.random.normal(ko, (num_layers, d_model, d_model), jnp.float32) * s
    wqkv = jnp.concatenate([wq, wk, wv], axis=-1)        # (num_layers, D, 3D)
    return wqkv, wo


def _reference_encoder(x, wqkv_stack, wo_stack):
    """Pure-JAX f32 reference mirroring ComplexEncoder.forward."""
    B, L, D = x.shape
    scale = 1.0 / sqrt(D)
    for i in range(wqkv_stack.shape[0]):
        wq, wk, wv = jnp.split(wqkv_stack[i], 3, axis=-1)
        q = x @ wq
        k = x @ wk
        v = x @ wv
        s = jnp.einsum("bqd,bkd->bqk", q, k) * scale
        p = jax.nn.softmax(s, axis=-1)
        ctx = jnp.einsum("bqk,bkd->bqd", p, v)
        x = x + ctx @ wo_stack[i]
    return x


if __name__ == "__main__":
    B, L, D = 2, 8, 32          # batch, seq, d_model
    NUM_LAYERS = 3

    key = jax.random.PRNGKey(0)
    kx, kw = jax.random.split(key)
    x = jax.random.normal(kx, (B, L, D), jnp.float32)
    wqkv_stack, wo_stack = init_layer_params(kw, NUM_LAYERS, D)

    # batch_block=1 exercises the 2-D (parallel batch, arbitrary layer) grid.
    out = jax.block_until_ready(
        complex_encoder(x, wqkv_stack, wo_stack, batch_block=1))
    assert out.shape == (B, L, D) and out.dtype == jnp.float32

    ref = _reference_encoder(x, wqkv_stack, wo_stack)
    max_err = float(jnp.max(jnp.abs(out - ref)))
    # bf16 weights / matmul operands with an f32 residual stream: allow
    # bf16-level mismatch against the pure-f32 reference.
    assert jnp.allclose(out, ref, rtol=5e-2, atol=5e-2), max_err

    print("KERNEL_OK")
</pallas_src>

<mosaic_0001>
module attributes {stable_mosaic.version = 11 : i64} {
  func.func @_encoder_kernel(%arg0: i32, %arg1: i32, %arg2: memref<2x8x128xf32, #tpu.memory_space<any>>, %arg3: memref<1x128x384xbf16, #tpu.memory_space<vmem>>, %arg4: memref<1x128x128xbf16, #tpu.memory_space<vmem>>, %arg5: memref<1x8x128xf32, #tpu.memory_space<vmem>>) attributes {dimension_semantics = [#tpu.dimension_semantics<parallel>, #tpu.dimension_semantics<arbitrary>], iteration_bounds = array<i64: 2, 3>, scalar_prefetch = 0 : i64, scratch_operands = 0 : i64, tpu.core_type = #tpu.core_type<tc>, window_params = [{}, {transform_indices = @transform_1, window_bounds = array<i64: 1, 128, 384>}, {transform_indices = @transform_2, window_bounds = array<i64: 1, 128, 128>}, {transform_indices = @transform_3, window_bounds = array<i64: 1, 8, 128>}]} {
    %c0_i32 = arith.constant 0 : i32
    %0 = arith.cmpi eq, %arg1, %c0_i32 : i32
    %1 = arith.extui %0 : i1 to i32
    %c0_i32_0 = arith.constant 0 : i32
    %2 = arith.cmpi ne, %1, %c0_i32_0 : i32
    scf.if %2 {
      %c1_i32 = arith.constant 1 : i32
      %37 = arith.muli %arg0, %c1_i32 : i32
      %38 = tpu.assume_multiple %37, 1 : i32
      "tpu.region"() ({
        %39 = tpu.sem_alloc : memref<!tpu.dma_semaphore, #tpu.memory_space<semaphore_mem>>
        %c0_i32_17 = arith.constant 0 : i32
        %c0_i32_18 = arith.constant 0 : i32
        %40 = tpu.memref_slice %arg2[%38, %c0_i32_17, %c0_i32_18] : memref<2x8x128xf32, #tpu.memory_space<any>> -> memref<1x8x128xf32, #tpu.memory_space<any>>
        tpu.enqueue_dma source(%40 : memref<1x8x128xf32, #tpu.memory_space<any>>) target(%arg5 : memref<1x8x128xf32, #tpu.memory_space<vmem>>) target_semaphore(%39 : memref<!tpu.dma_semaphore, #tpu.memory_space<semaphore_mem>>)
        %c0_i32_19 = arith.constant 0 : i32
        %c0_i32_20 = arith.constant 0 : i32
        %41 = tpu.memref_slice %arg2[%38, %c0_i32_19, %c0_i32_20] : memref<2x8x128xf32, #tpu.memory_space<any>> -> memref<1x8x128xf32, #tpu.memory_space<any>>
        tpu.wait_dma2 semaphore(%39 : memref<!tpu.dma_semaphore, #tpu.memory_space<semaphore_mem>>) src(%41 : memref<1x8x128xf32, #tpu.memory_space<any>>) dst(%arg5 : memref<1x8x128xf32, #tpu.memory_space<vmem>>)
        tpu.yield
      }) : () -> ()
    } else {
    }
    %c0 = arith.constant 0 : index
    %c0_1 = arith.constant 0 : index
    %c0_2 = arith.constant 0 : index
    %3 = vector.load %arg5[%c0, %c0_1, %c0_2] : memref<1x8x128xf32, #tpu.memory_space<vmem>>, vector<1x8x128xf32>
    %4 = vector.shape_cast %3 : vector<1x8x128xf32> to vector<8x128xf32>
    %c0_3 = arith.constant 0 : index
    %c0_4 = arith.constant 0 : index
    %c0_5 = arith.constant 0 : index
    %5 = vector.load %arg3[%c0_3, %c0_4, %c0_5] : memref<1x128x384xbf16, #tpu.memory_space<vmem>>, vector<1x128x384xbf16>
    %6 = vector.shape_cast %5 : vector<1x128x384xbf16> to vector<128x384xbf16>
    %c0_6 = arith.constant 0 : index
    %c0_7 = arith.constant 0 : index
    %c0_8 = arith.constant 0 : index
    %7 = vector.load %arg4[%c0_6, %c0_7, %c0_8] : memref<1x128x128xbf16, #tpu.memory_space<vmem>>, vector<1x128x128xbf16>
    %8 = vector.shape_cast %7 : vector<1x128x128xbf16> to vector<128x128xbf16>
    %9 = arith.truncf %4 : vector<8x128xf32> to vector<8x128xbf16>
    %cst = arith.constant dense<0.000000e+00> : vector<8x384xf32>
    %10 = tpu.matmul %9, %6, %cst {dimension_numbers = #tpu.dot_dimension_numbers<[1], [0], [0], [1], [0, 0, 1, 1], [], []>} : vector<8x128xbf16>, vector<128x384xbf16>, vector<8x384xf32> -> vector<8x384xf32>
    %11 = vector.shape_cast %10 : vector<8x384xf32> to vector<1x8x384xf32>
    %12 = vector.extract_strided_slice %11 {offsets = [0, 0, 0], sizes = [1, 8, 128], strides = [1, 1, 1]} : vector<1x8x384xf32> to vector<1x8x128xf32>
    %13 = arith.truncf %12 : vector<1x8x128xf32> to vector<1x8x128xbf16>
    %14 = vector.extract_strided_slice %11 {offsets = [0, 0, 128], sizes = [1, 8, 128], strides = [1, 1, 1]} : vector<1x8x384xf32> to vector<1x8x128xf32>
    %15 = arith.truncf %14 : vector<1x8x128xf32> to vector<1x8x128xbf16>
    %16 = vector.extract_strided_slice %11 {offsets = [0, 0, 256], sizes = [1, 8, 128], strides = [1, 1, 1]} : vector<1x8x384xf32> to vector<1x8x128xf32>
    %17 = arith.truncf %16 : vector<1x8x128xf32> to vector<1x8x128xbf16>
    "tpu.trace_start"() <{level = 10 : i32, message = "bqd,bkd->bqk"}> : () -> ()
    %cst_9 = arith.constant dense<0.000000e+00> : vector<1x8x8xf32>
    %18 = tpu.matmul %13, %15, %cst_9 {dimension_numbers = #tpu.dot_dimension_numbers<[2], [2], [1], [1], [0, 0, 0, 1, 1, 1], [0], [0]>} : vector<1x8x128xbf16>, vector<1x8x128xbf16>, vector<1x8x8xf32> -> vector<1x8x8xf32>
    "tpu.trace_stop"() : () -> ()
    %cst_10 = arith.constant dense<0xFF800000> : vector<1x8xf32>
    %19 = vector.multi_reduction <maximumf>, %18, %cst_10 [2] : vector<1x8x8xf32> to vector<1x8xf32>
    %20 = vector.shape_cast %19 : vector<1x8xf32> to vector<1x8x1xf32>
    %21 = vector.broadcast %20 : vector<1x8x1xf32> to vector<1x8x8xf32>
    %22 = arith.subf %18, %21 : vector<1x8x8xf32>
    %23 = math.exp %22 : vector<1x8x8xf32>
    %cst_11 = arith.constant dense<0.000000e+00> : vector<1x8xf32>
    %24 = vector.multi_reduction <add>, %23, %cst_11 [2] : vector<1x8x8xf32> to vector<1x8xf32>
    %25 = vector.shape_cast %24 : vector<1x8xf32> to vector<1x8x1xf32>
    %26 = tpu.reciprocal %25 {approx = true} : vector<1x8x1xf32> -> vector<1x8x1xf32>
    %27 = vector.broadcast %26 : vector<1x8x1xf32> to vector<1x8x8xf32>
    %28 = arith.mulf %23, %27 : vector<1x8x8xf32>
    %29 = arith.truncf %28 : vector<1x8x8xf32> to vector<1x8x8xbf16>
    "tpu.trace_start"() <{level = 10 : i32, message = "bqk,bkd->bqd"}> : () -> ()
    %cst_12 = arith.constant dense<0.000000e+00> : vector<1x8x128xf32>
    %30 = tpu.matmul %29, %17, %cst_12 {dimension_numbers = #tpu.dot_dimension_numbers<[2], [1], [1], [2], [0, 0, 0, 1, 1, 2], [0], [0]>} : vector<1x8x8xbf16>, vector<1x8x128xbf16>, vector<1x8x128xf32> -> vector<1x8x128xf32>
    "tpu.trace_stop"() : () -> ()
    %31 = vector.shape_cast %30 : vector<1x8x128xf32> to vector<8x128xf32>
    %32 = arith.truncf %31 : vector<8x128xf32> to vector<8x128xbf16>
    %cst_13 = arith.constant dense<0.000000e+00> : vector<8x128xf32>
    %33 = tpu.matmul %32, %8, %cst_13 {dimension_numbers = #tpu.dot_dimension_numbers<[1], [0], [0], [1], [0, 0, 1, 1], [], []>} : vector<8x128xbf16>, vector<128x128xbf16>, vector<8x128xf32> -> vector<8x128xf32>
    %34 = vector.shape_cast %33 : vector<8x128xf32> to vector<1x8x128xf32>
    %35 = arith.addf %3, %34 : vector<1x8x128xf32>
    %c0_14 = arith.constant 0 : index
    %c0_15 = arith.constant 0 : index
    %c0_16 = arith.constant 0 : index
    %36 = vector.load %arg5[%c0_14, %c0_15, %c0_16] : memref<1x8x128xf32, #tpu.memory_space<vmem>>, vector<1x8x128xf32>
    tpu.vector_store %arg5[%c0_14, %c0_15, %c0_16], %35 {strides = array<i32>} : memref<1x8x128xf32, #tpu.memory_space<vmem>>, vector<1x8x128xf32>,
    return
  }
  func.func @transform_1(%arg0: i32, %arg1: i32) -> (i32, i32, i32) {
    %c0_i32 = arith.constant 0 : i32
    %c0_i32_0 = arith.constant 0 : i32
    %c0_i32_1 = arith.constant 0 : i32
    return %arg1, %c0_i32, %c0_i32_0 : i32, i32, i32
  }
  func.func @transform_2(%arg0: i32, %arg1: i32) -> (i32, i32, i32) {
    %c0_i32 = arith.constant 0 : i32
    %c0_i32_0 = arith.constant 0 : i32
    %c0_i32_1 = arith.constant 0 : i32
    return %arg1, %c0_i32, %c0_i32_0 : i32, i32, i32
  }
  func.func @transform_3(%arg0: i32, %arg1: i32) -> (i32, i32, i32) {
    %c0_i32 = arith.constant 0 : i32
    %c0_i32_0 = arith.constant 0 : i32
    %c0_i32_1 = arith.constant 0 : i32
    return %arg0, %c0_i32, %c0_i32_0 : i32, i32, i32
  }
}

</mosaic_0001>

<bundles_post_ra>
// kernel: tpu_custom_call.1
= control target key start
LH: loop header
LB: loop body
LE: loop exit
PB: predicated region body
PF: predicated region fallthrough
CT: control target
= control target key end

     0   :  { %s1695_s0 = inlined_call_operand.hbm [shape: f32[2,8,128], index: 0, kind: input, shape index: {}]   ;;  %s1696_s1 = inlined_call_operand.hbm [shape: bf16[3,128,384], index: 1, kind: input, shape index: {}]   ;;  %s1697_s2 = inlined_call_operand.hbm [shape: bf16[3,128,128], index: 2, kind: input, shape index: {}]   ;;  %s1698_s3 = inlined_call_operand.hbm [shape: f32[2,8,128], index: 3, kind: output, shape index: {}]  }
   0x1   :  { %1704 = sst [smem:[#allocation21_spill]] %s1696_s1 }
   0x2   :  { %8 = vsyncpa [#allocation3], 0 }
   0x3   :  { %10 = vsyncpa [#allocation3 + $0x1], 0 }
   0x4   :  { %11 = vsyncpa [#allocation6], 0 }
   0x5   :  { %13 = vsyncpa [#allocation6 + $0x1], 0 }
   0x6   :  { %14 = vsyncpa [#allocation4], 0 }
   0x7   :  { %16 = vsyncpa [#allocation4 + $0x1], 0  ;;  %s1344_s12 = smov 0   ;;  %s1346_s13 = smov 0  }
   0x8   :  { %s1348_s14 = smov 0   ;;  %s1350_s15 = smov 0  }
   0x9   :  { %s1352_s16 = smov 0   ;;  %s1354_s17 = smov 0  }
   0xa   :  { %s1356_s18 = smov 0   ;;  %s1358_s19 = smov 0  }
   0xb   :  { %s1360_s20 = smov 0   ;;  %s1362_s21 = smov 0  }
   0xc   :  { %s1364_s22 = smov 0  }
   0xd LB: > { %1705 = sst [smem:[#allocation17_spill]] %s1307_s21  ;;  %s811_s23 = sadd.s32 4294967295, %s1311_s22   ;;  %s1311_s22 = sphi %s1364_s22, %s22_s22   ;;  %s1307_s21 = sphi %s1362_s21, %s1722_s21   ;;  %s1303_s20 = sphi %s1360_s20, %s1730_s20   ;;  %s1299_s19 = sphi %s1358_s19, %s1720_s19   ;;  %s1295_s18 = sphi %s1356_s18, %s1729_s18   ;;  %s1291_s17 = sphi %s1354_s17, %s1728_s17   ;;  %s1287_s16 = sphi %s1352_s16, %s1727_s16   ;;  %s1283_s15 = sphi %s1350_s15, %s1726_s15   ;;  %s1279_s14 = sphi %s1348_s14, %s1725_s14   ;;  %s1275_s13 = sphi %s1346_s13, %s1724_s13   ;;  %s1271_s12 = sphi %s1344_s12, %s1723_s12  }
   0xe   : > { %s812_s24 = sadd.s32 4294967294, %s1311_s22   ;;  %s31_s25 = sadd.s32 1, %s1303_s20 }
   0xf   : > { %s34_s26 = sadd.s32 1, %s1307_s21  ;;  %p32_p0 = scmp.ge.s32.totalorder %s31_s25, 3 }
  0x10   : > { %s41_s27 = sadd.s32 1, %s1291_s17  ;;  %p48_p1 = scmp.ne.s32.totalorder %s1291_s17, %s1287_s16 }
  0x11   : > { %p49_p2 = scmp.eq.s32.totalorder %s1311_s22, 0  ;;  %s1732_s25 = smov (%p32_p0, %s31_s25), 0 }
  0x12   : > { %1706 = sst [smem:[#allocation18_spill]] %s1732_s25  ;;  %s1734_s26 = smov (!%p32_p0, %s34_s26), %s1307_s21 }
  0x13   : > { %s38_s28 = ssub.s32 %s1303_s20, %s1732_s25  ;;  %p1410_p3 = por %p49_p2, %p48_p1 }
  0x14   : > { %p36_p4 = scmp.ge.s32.totalorder %s1734_s26, 2  ;;  %p39_p5 = scmp.eq.s32.totalorder %s38_s28, 0 }
  0x15   : > { %p54_p6 = scmp.ne.s32.totalorder %s1287_s16, %s1283_s15  ;;  %p55_p7 = scmp.eq.s32.totalorder %s811_s23, 0 }
  0x16   : > { %s1736_s26 = smov (%p36_p4, %s1734_s26), 0  ;;  %s93_s6 = sadd.s32 1, %s1279_s14 }
  0x17   : > { %1708 = sst [smem:[#allocation19_spill]] %s1736_s26  ;;  %p1420_p8 = por %p55_p7, %p54_p6 }
  0x18   : > { %s1418_s30 = scalar_select %p39_p5, %s1291_s17, %s41_s27  }
  0x19   : > { %s1710_s4 = scalar_select %p1420_p8, 1, 0 }
  0x1a   : > { %1709 = sst [smem:[#allocation20_spill]] %s1418_s30  ;;  %s90_s5 = ssub.s32 %s1307_s21, %s1736_s26 }
  0x1b   : > { %p91_p9 = scmp.eq.s32.totalorder %s90_s5, 0  ;;  %p103_p10 = scmp.ne.s32.totalorder %s1279_s14, %s1275_s13 }
  0x1c   : > { %p104_p11 = scmp.eq.s32.totalorder %s811_s23, 5  ;;  %p109_p13 = scmp.ne.s32.totalorder %s1275_s13, %s1271_s12 }
  0x1d   : > { %s1430_s7 = scalar_select %p91_p9, %s1279_s14, %s93_s6  }
  0x1e   : > { %p1432_p12 = por %p104_p11, %p103_p10  ;;  %p110_p0 = scmp.eq.s32.totalorder %s812_s24, 5 }
  0x1f   : > { %p958_p1 = scmp.lt.s32.totalorder %s1311_s22, 6  ;;  %s1440_s9 = sand.u32 1, %s1291_s17  }
  0x20   : > { %s1711_s8 = scalar_select %p1432_p12, 1, 0 }
  0x21   : > { %p1442_p2 = por %p110_p0, %p109_p13  ;;  %s938_s11 = smul.u32 192, %s1440_s9 }
  0x22   : > { %p1449_p4 = pnand %p958_p1, %p1410_p3  ;;  %s939_s23 = smul.u32 3072, %s1303_s20 }
  0x23   : > { %s1712_s10 = scalar_select %p1442_p2, 1, 0 }
  0x24   : > { %s1714_s1 = sld [smem:[#allocation21_spill]]  ;;  %s134_s5 = scalar_lea.vmem [#allocation2], %s938_s11 }
  0x25   : > { %s141_s6 = sshll.u32 %s134_s5, 4  ;;  %s131_s29 = scalar_lea.sflag [#allocation3], %s1440_s9  ;;  %s1459_s6 = int_to_ptr.vmem [resolvable:$true] %s141_s6 }
  0x26   : > { %p1101_p5 = pneg %p1449_p4 }
  0x2a   : > { %s1457_s28 = scalar_lea.hbm %s1714_s1, %s939_s23  ;;  %s1104_s24 = scalar_lea.hbm %s1714_s1, 9216 }
  0x2b   : > { %s1099_s26 = scalar_lea.hbm %s1457_s28, 3072  ;;  %p1105_p9 = scmp.lt.u32.totalorder %s1457_s28, %s1714_s1 }
  0x2c   : > { %p1100_p3 = scmp.ne.s32.totalorder %s1457_s28, %s1099_s26  ;;  %p1106_p10 = scmp.lt.u32.totalorder %s1104_s24, %s1099_s26 }
  0x2d   : > { %p1108_p13 = scmp.lt.u32.totalorder %s1099_s26, %s1457_s28 }
  0x2e   : > { %p1102_p6 = pnand %p1101_p5, %p1100_p3  ;;  %p1107_p11 = por %p1106_p10, %p1105_p9 }
  0x30   : > { %p1103_p7 = pneg %p1102_p6  ;;  %p1109_p0 = por %p1108_p13, %p1107_p11 }
  0x32   : > { %p1110_p1 = pnand %p1109_p0, %p1103_p7 }
  0x34   : > { %1113 = shalt.err (!%p1110_p1)
}
  0x35   : > { %s1114_s11 = scalar_lea.vmem %s1459_s6, 3072  ;;  %s1313_s5 = smov [#allocation2]  }
  0x36   : > { %p1115_p3 = scmp.ne.s32.totalorder %s1459_s6, %s1114_s11  ;;  %s1119_s27 = sshll.u32 %s1313_s5, 4  ;;  %s1120_s27 = int_to_ptr.vmem [resolvable:$false] %s1119_s27 }
  0x37   : > { %s1121_s21 = scalar_lea.vmem %s1120_s27, 6144  ;;  %p1122_p12 = scmp.lt.s32.totalorder %s1459_s6, %s1120_s27 }
  0x38   : > { %p1117_p6 = pnand %p1115_p3, %p1101_p5  ;;  %p1123_p9 = scmp.lt.s32.totalorder %s1121_s21, %s1114_s11 }
  0x3a   : > { %p1118_p2 = pneg %p1117_p6  ;;  %p1124_p10 = por %p1123_p9, %p1122_p12 }
  0x3c   : > { %p1125_p11 = pnand %p1124_p10, %p1118_p2 }
  0x3e   : > { %1128 = shalt.err (!%p1125_p11)
}
  0x3f   : > { %s1314_s25 = smov 192   ;;  %s1315_s26 = smov 12  }
  0x40   : > { %950 = dma.hbm_to_vmem [thread:$0]  (!%p1449_p4), %s1457_s28, 3072, %s1459_s6, %s131_s29, %s1314_s25, %s1314_s25, %s1315_s26  }
  0x41   : > { %p819_p7 = scmp.ge.s32.totalorder %s1311_s22, 1  ;;  %p170_p13 = scmp.lt.s32.totalorder %s1311_s22, 7 }
  0x42   : > { %s816_s23 = sshll.u32 %s1440_s9, 6  ;;  %s862_s11 = sshll.u32 %s1303_s20, 10 }
  0x43   : > { %p1492_p12 = pnand %p819_p7, %p170_p13  ;;  %s155_s5 = scalar_lea.vmem [#allocation5], %s816_s23 }
  0x44   : > { %s162_s27 = sshll.u32 %s155_s5, 4  ;;  %s1500_s30 = scalar_lea.hbm %s1697_s2, %s862_s11  ;;  %s1502_s27 = int_to_ptr.vmem [resolvable:$true] %s162_s27 }
  0x45   : > { %s152_s28 = scalar_lea.sflag [#allocation6], %s1440_s9  ;;  %s1129_s6 = scalar_lea.hbm %s1500_s30, 1024 }
  0x46   : > { %p1130_p2 = scmp.ne.s32.totalorder %s1500_s30, %s1129_s6  ;;  %s1134_s26 = scalar_lea.hbm %s1697_s2, 3072 }
  0x47   : > { %p1135_p3 = scmp.lt.u32.totalorder %s1500_s30, %s1697_s2  ;;  %p1136_p6 = scmp.lt.u32.totalorder %s1134_s26, %s1129_s6 }
  0x48   : > { %p1132_p0 = pnand %p1130_p2, %p1101_p5  ;;  %p1138_p10 = scmp.lt.u32.totalorder %s1129_s6, %s1500_s30 }
  0x49   : > { %p1137_p9 = por %p1136_p6, %p1135_p3 }
  0x4a   : > { %p1133_p1 = pneg %p1132_p0 }
  0x4b   : > { %p1139_p11 = por %p1138_p10, %p1137_p9 }
  0x4d   : > { %p1140_p7 = pnand %p1139_p11, %p1133_p1 }
  0x4f   : > { %1143 = shalt.err (!%p1140_p7)
}
  0x50   : > { %s1144_s11 = scalar_lea.vmem %s1502_s27, 1024  ;;  %s1316_s5 = smov [#allocation5]  }
  0x51   : > { %p1145_p13 = scmp.ne.s32.totalorder %s1502_s27, %s1144_s11  ;;  %s1149_s21 = sshll.u32 %s1316_s5, 4  ;;  %s1150_s21 = int_to_ptr.vmem [resolvable:$false] %s1149_s21 }
  0x52   : > { %s1151_s29 = scalar_lea.vmem %s1150_s21, 2048  ;;  %p1152_p8 = scmp.lt.s32.totalorder %s1502_s27, %s1150_s21 }
  0x53   : > { %p1147_p2 = pnand %p1145_p13, %p1101_p5  ;;  %p1153_p3 = scmp.lt.s32.totalorder %s1151_s29, %s1144_s11 }
  0x55   : > { %p1148_p0 = pneg %p1147_p2  ;;  %p1154_p6 = por %p1153_p3, %p1152_p8 }
  0x57   : > { %p1155_p9 = pnand %p1154_p6, %p1148_p0 }
  0x59   : > { %1158 = shalt.err (!%p1155_p9)
}
  0x5a   : > { %s1317_s6 = smov 64   ;;  %s1318_s25 = smov 4  }
  0x5b   : > { %953 = dma.hbm_to_vmem [thread:$0]  (!%p1449_p4), %s1500_s30, 1024, %s1502_s27, %s152_s28, %s1317_s6, %s1317_s6, %s1318_s25  }
  0x5c   : > { %174 = sbr.rel (%p1492_p12) target bundleno = 1363 (0x553), region = 28  ;;  %s176_s26 = sand.u32 (!%p1492_p12), 1, %s1287_s16  }
  0x5d   : > { %s940_s1 = smul.u32 (!%p1492_p12), 192, %s176_s26  ;;  %s177_s23 = scalar_lea.sflag (!%p1492_p12), [#allocation3], %s176_s26 }
  0x5e   : > { %p1716_p8 = scmp.ne.s32.totalorder (!%p1492_p12), %s1710_s4, 0 }
  0x5f   : > { %s1533_s11 = scalar_lea.vmem (!%p1492_p12), [#allocation2], %s940_s1 }
  0x63   : > { %1256 = dma.done.wait (%p1716_p8), %s177_s23, 3072  }
  0x64   : > { %1258 = vsyncadd (%p1716_p8), %s177_s23, 4294964224  ;;  %s820_s5 = sshll.u32 %s176_s26, 6  ;;  %s186_s15 = scalar_lea.sflag [#allocation6], %s176_s26 }
  0x65   : > { %s1539_s9 = scalar_lea.vmem [#allocation5], %s820_s5 }
  0x66   : > { %1260 = dma.done.wait (%p1716_p8), %s186_s15, 1024  }
  0x67   : > { %1262 = vsyncadd (%p1716_p8), %s186_s15, 4294966272  ;;  %s212_s30 = sand.u32 1, %s1275_s13   ;;  %p822_p4 = scmp.ne.s32.totalorder %s1295_s18, 0 }
  0x68   : > { %s821_s24 = sshll.u32 %s212_s30, 3 }
  0x69   : > { %s1548_s27 = scalar_lea.vmem [#allocation7], %s821_s24  ;;  %219 = sbr.rel (%p822_p4) target bundleno = 137 (0x89), region = 40 }
  0x70   : > { %s863_s28 = sshll.u32 %s1299_s19, 7  ;;  %s230_s21 = sshll.u32 %s1548_s27, 4  ;;  %s231_s21 = int_to_ptr.vmem [resolvable:$true] %s230_s21 }
  0x71   : > { %s222_s25 = scalar_lea.hbm %s1695_s0, %s863_s28  ;;  %s1161_s23 = scalar_lea.hbm %s1695_s0, 256 }
  0x72   : > { %s1159_s4 = scalar_lea.hbm %s222_s25, 128  ;;  %p1162_p12 = scmp.lt.u32.totalorder %s222_s25, %s1695_s0 }
  0x73   : > { %p1160_p5 = scmp.ne.s32.totalorder %s222_s25, %s1159_s4  ;;  %p1163_p1 = scmp.lt.u32.totalorder %s1161_s23, %s1159_s4 }
  0x74   : > { %p1165_p11 = scmp.lt.u32.totalorder %s1159_s4, %s222_s25 }
  0x75   : > { %p1164_p10 = por %p1163_p1, %p1162_p12 }
  0x77   : > { %p1166_p7 = por %p1165_p11, %p1164_p10 }
  0x79   : > { %p1167_p13 = pnand %p1166_p7, %p1160_p5 }
  0x7b   : > { %1170 = shalt.err (!%p1167_p13)  }
  0x7c   : > { %s1171_s18 = scalar_lea.vmem %s231_s21, 128  ;;  %s1319_s24 = smov [#allocation7]  }
  0x7d   : > { %p1172_p2 = scmp.ne.s32.totalorder %s231_s21, %s1171_s18  ;;  %s1173_s28 = sshll.u32 %s1319_s24, 4  ;;  %s1174_s28 = int_to_ptr.vmem [resolvable:$false] %s1173_s28 }
  0x7e   : > { %s1175_s29 = scalar_lea.vmem %s1174_s28, 256  ;;  %p1176_p0 = scmp.lt.s32.totalorder %s231_s21, %s1174_s28 }
  0x7f   : > { %p1177_p3 = scmp.lt.s32.totalorder %s1175_s29, %s1171_s18 }
  0x81   : > { %p1178_p6 = por %p1177_p3, %p1176_p0 }
  0x83   : > { %p1179_p9 = pnand %p1178_p6, %p1172_p2 }
  0x85   : > { %1182 = shalt.err (!%p1179_p9)  }
  0x86   : > { %233 = dma.hbm_to_vmem [thread:$0]  %s222_s25, 128, %s231_s21, [#allocation8] }
  0x87   : > { %1263 = dma.done.wait [#allocation8], 128 }
  0x88   : > { %1264 = vsyncadd [#allocation8], 4294967168 }
  0x89 PF: > { %v1055_v0 = vld [vmem:[%s1533_s11 + $0x4] ss:$12 sps:$4 sm:$0xff]   ;;  %v1057_v1 = vld [vmem:[%s1533_s11] ss:$12 sps:$4 sm:$0xff]   ;;  %v1320_v2 = vmov 0   ;;  %v1321_v3 = vmov 0.0  }
  0x8a   : > { %448 = vmatprep.mubr.bf16.mxu0 %v1320_v2  ;;  %886 = vmatprep.subr.bf16.mxu1 %v1321_v3  ;;  %v1058_v4 = vld [vmem:[%s1533_s11 + $0x1c] ss:$12 sps:$4 sm:$0xff]   ;;  %v1060_v5 = vld [vmem:[%s1533_s11 + $0x18] ss:$12 sps:$4 sm:$0xff]   ;;  %v1061_v6 = vld [vmem:[%s1533_s11 + $0x34] ss:$12 sps:$4 sm:$0xff]  }
  0x8b   : > { %416 = vmatprep.subr.bf16.mxu0 %v1055_v0  ;;  %v1063_v7 = vld [vmem:[%s1533_s11 + $0x30] ss:$12 sps:$4 sm:$0xff]   ;;  %v1064_v8 = vld [vmem:[%s1533_s11 + $0x4c] ss:$12 sps:$4 sm:$0xff]   ;;  %v1066_v9 = vld [vmem:[%s1533_s11 + $0x48] ss:$12 sps:$4 sm:$0xff]  }
  0x8c   : > { %417 = vmatpush1.bf16.msra.mxu0 %v1057_v1  ;;  %v1079_v10 = vld [vmem:[%s1533_s11 + $0x8] ss:$12 sps:$4 sm:$0xff]   ;;  %v1067_v11 = vld [vmem:[%s1533_s11 + $0x64] ss:$12 sps:$4 sm:$0xff]   ;;  %v1080_v12 = vld [vmem:[%s1533_s11 + $0x20] ss:$12 sps:$4 sm:$0xff]  }
  0x8d   : > { %418 = vmatprep.subr.bf16.mxu0 %v1058_v4  ;;  %887 = vmatpush3.bf16.msra.mxu1 %v1079_v10  ;;  %v1069_v13 = vld [vmem:[%s1533_s11 + $0x60] ss:$12 sps:$4 sm:$0xff]   ;;  %v1070_v14 = vld [vmem:[%s1533_s11 + $0x7c] ss:$12 sps:$4 sm:$0xff]   ;;  %v1072_v15 = vld [vmem:[%s1533_s11 + $0x78] ss:$12 sps:$4 sm:$0xff]  }
  0x8e   : > { %888 = vmatprep.subr.bf16.mxu1 %v1321_v3  ;;  %v1081_v16 = vld [vmem:[%s1533_s11 + $0x38] ss:$12 sps:$4 sm:$0xff]   ;;  %v1073_v17 = vld [vmem:[%s1533_s11 + $0x94] ss:$12 sps:$4 sm:$0xff]   ;;  %v1082_v18 = vld [vmem:[%s1533_s11 + $0x50] ss:$12 sps:$4 sm:$0xff]  }
  0x8f   : > { %v1075_v19 = vld [vmem:[%s1533_s11 + $0x90] ss:$12 sps:$4 sm:$0xff]   ;;  %v1076_v20 = vld [vmem:[%s1533_s11 + $0xac] ss:$12 sps:$4 sm:$0xff]   ;;  %v1083_v21 = vld [vmem:[%s1533_s11 + $0x68] ss:$12 sps:$4 sm:$0xff]  }
  0x90   : > { %419 = vmatpush1.bf16.msra.mxu0 %v1060_v5  ;;  %v1078_v22 = vld [vmem:[%s1533_s11 + $0xa8] ss:$12 sps:$4 sm:$0xff]   ;;  %v1084_v24 = vld [vmem:[%s1533_s11 + $0x80] ss:$12 sps:$4 sm:$0xff]   ;;  %v1085_v26 = vld [vmem:[%s1533_s11 + $0x98] ss:$12 sps:$4 sm:$0xff]  }
  0x91   : > { %420 = vmatprep.subr.bf16.mxu0 %v1061_v6  ;;  %889 = vmatpush3.bf16.msra.mxu1 %v1080_v12  ;;  %v1589_v23 = vld [vmem:[%s1548_s27] sm:$0xff]  ;;  %v1086_v27 = vld [vmem:[%s1533_s11 + $0xb0] ss:$12 sps:$4 sm:$0xff]   ;;  %vm1322_vm0 = vmmov 0   ;;  %vm556_vm1 = vcmask 1043456   ;;  %vm540_vm2 = vcmask 64512  }
  0x92   : > { %890 = vmatprep.subr.bf16.mxu1 %v1321_v3  ;;  %v287_v25 = vpack.c.bf16 %v1589_v23, %v1589_v23  ;;  %902 = vmatprep.mubr.msk.bf16.mxu1 %vm1322_vm0, %v1321_v3  ;;  %v1087_v50 = vld [vmem:[%s1539_s9] sm:$0xff]   ;;  %v1088_v51 = vld [vmem:[%s1539_s9 + $0x8] sm:$0xff]   ;;  %v1089_v52 = vld [vmem:[%s1539_s9 + $0x10] sm:$0xff]   ;;  %s859_s11 = sshll.u32 %s1299_s19, 7  ;;  %s705_s21 = sshll.u32 %s1548_s27, 4  ;;  %s1632_s21 = int_to_ptr.vmem [resolvable:$true] %s705_s21 }
  0x93   : > { %v1090_v53 = vld [vmem:[%s1539_s9 + $0x18] sm:$0xff]   ;;  %v1091_v54 = vld [vmem:[%s1539_s9 + $0x20] sm:$0xff]   ;;  %v1092_v55 = vld [vmem:[%s1539_s9 + $0x28] sm:$0xff]   ;;  %s692_s19 = scalar_lea.sflag [#allocation4], %s212_s30  ;;  %s1183_s4 = scalar_lea.vmem %s1632_s21, 128 }
  0x94   : > { %421 = vmatpush1.bf16.msra.mxu0 %v1063_v7  ;;  %v1093_v56 = vld [vmem:[%s1539_s9 + $0x30] sm:$0xff]   ;;  %v1094_v61 = vld [vmem:[%s1539_s9 + $0x38] sm:$0xff]   ;;  %s1630_s9 = scalar_lea.hbm %s1698_s3, %s859_s11  ;;  %p1184_p8 = scmp.ne.s32.totalorder %s1632_s21, %s1183_s4 }
  0x95   : > { %422 = vmatprep.subr.bf16.mxu0 %v1064_v8  ;;  %891 = vmatpush3.bf16.msra.mxu1 %v1081_v16  ;;  %p1717_p4 = scmp.ne.s32.totalorder %s1711_s8, 0  ;;  %s1323_s26 = smov [#allocation7]  }
  0x96   : > { %892 = vmatprep.subr.bf16.mxu1 %v1321_v3  ;;  %s1187_s1 = sshll.u32 %s1323_s26, 4  ;;  %s1188_s1 = int_to_ptr.vmem [resolvable:$false] %s1187_s1 }
  0x97   : > { %p1185_p5 = pnand %p1184_p8, %p1717_p4  ;;  %s1189_s23 = scalar_lea.vmem %s1188_s1, 256 }
  0x98   : > { %423 = vmatpush1.bf16.msra.mxu0 %v1066_v9  ;;  %p1190_p1 = scmp.lt.s32.totalorder %s1632_s21, %s1188_s1  ;;  %p1191_p10 = scmp.lt.s32.totalorder %s1189_s23, %s1183_s4 }
  0x99   : > { %424 = vmatprep.subr.bf16.mxu0 %v1067_v11  ;;  %893 = vmatpush3.bf16.msra.mxu1 %v1082_v18  ;;  %p1186_p12 = pneg %p1185_p5 }
  0x9a   : > { %894 = vmatprep.subr.bf16.mxu1 %v1321_v3  ;;  %p1192_p11 = por %p1191_p10, %p1190_p1 }
  0x9c   : > { %425 = vmatpush1.bf16.msra.mxu0 %v1069_v13  ;;  %p1193_p7 = pnand %p1192_p11, %p1186_p12 }
  0x9d   : > { %426 = vmatprep.subr.bf16.mxu0 %v1070_v14  ;;  %895 = vmatpush3.bf16.msra.mxu1 %v1083_v21 }
  0x9e   : > { %896 = vmatprep.subr.bf16.mxu1 %v1321_v3 }
  0xa0   : > { %427 = vmatpush1.bf16.msra.mxu0 %v1072_v15 }
  0xa1   : > { %428 = vmatprep.subr.bf16.mxu0 %v1073_v17  ;;  %897 = vmatpush3.bf16.msra.mxu1 %v1084_v24 }
  0xa2   : > { %898 = vmatprep.subr.bf16.mxu1 %v1321_v3 }
  0xa4   : > { %429 = vmatpush1.bf16.msra.mxu0 %v1075_v19 }
  0xa5   : > { %430 = vmatprep.subr.bf16.mxu0 %v1076_v20  ;;  %899 = vmatpush3.bf16.msra.mxu1 %v1085_v26 }
  0xa6   : > { %900 = vmatprep.subr.bf16.mxu1 %v1321_v3 }
  0xa8   : > { %431 = vmatpush1.bf16.msra.mxu0 %v1078_v22 }
  0xa9   : > { %918 = vmatprep.subr.bf16.mxu0 %v1321_v3  ;;  %901 = vmatpush3.bf16.msra.mxu1 %v1086_v27 }
  0xaa   : > { %906 = vmatprep.subr.bf16.mxu1 %v1321_v3 }
  0xab   : > { %449 = vmatmul.mubr.bf16.vlgmr.msra.gmra.mrb[0].mxu0 %v287_v25 }
  0xac   : > { %934 = vmatprep.mubr.msk.bf16.mxu0 %vm1322_vm0, %v1321_v3  ;;  %903 = vmatmul.mubr.bf16.vlgmr.msra.gmra.mrb[0].mxu1 %v287_v25 }
  0xad   : > { %908 = vmatprep.mubr.msk.bf16.mxu1 %vm1322_vm0, %v1321_v3  ;;  %919 = vmatpush3.bf16.msra.mxu0 %v1087_v50 }
  0xae   : > { %920 = vmatprep.subr.bf16.mxu0 %v1321_v3 }
  0xb1   : > { %921 = vmatpush3.bf16.msra.mxu0 %v1088_v51 }
  0xb2   : > { %922 = vmatprep.subr.bf16.mxu0 %v1321_v3 }
  0xb5   : > { %923 = vmatpush3.bf16.msra.mxu0 %v1089_v52 }
  0xb6   : > { %924 = vmatprep.subr.bf16.mxu0 %v1321_v3 }
  0xb9   : > { %925 = vmatpush3.bf16.msra.mxu0 %v1090_v53 }
  0xba   : > { %926 = vmatprep.subr.bf16.mxu0 %v1321_v3 }
  0xbd   : > { %927 = vmatpush3.bf16.msra.mxu0 %v1091_v54 }
  0xbe   : > { %928 = vmatprep.subr.bf16.mxu0 %v1321_v3 }
  0xc1   : > { %929 = vmatpush3.bf16.msra.mxu0 %v1092_v55 }
  0xc2   : > { %930 = vmatprep.subr.bf16.mxu0 %v1321_v3 }
  0xc5   : > { %931 = vmatpush3.bf16.msra.mxu0 %v1093_v56 }
  0xc6   : > { %932 = vmatprep.subr.bf16.mxu0 %v1321_v3 }
  0xc9   : > { %933 = vmatpush3.bf16.msra.mxu0 %v1094_v61 }
 0x17e   : > { %v450_v28 = vpop.f32.mrb[0].mxu0 }
 0x17f   : > { %v452_v29 = vpop.f32.mrb[1].mxu0  ;;  %v497_v33 = vpack.c.bf16 %v450_v28, %v450_v28  ;;  %v491_v34 = vpop.f32.mrb[0].mxu1 }
 0x180   : > { %v498_v30 = vpack.c.bf16 %v452_v29, %v452_v29  ;;  %v454_v31 = vpop.f32.mrb[2].mxu0  ;;  %v499_v35 = vpack.c.bf16 %v491_v34, %v491_v34  ;;  %v904_v36 = vpop.f32.mrb[1].mxu1 }
 0x181   : > { %v455_v32 = vpop.f32.mrb[3].mxu0  ;;  %v494_v37 = vpop.f32.mrb[2].mxu1 }
 0x182   : > { %907 = vmatpush3.bf16.xpose.msra.mxu1 %v498_v30  ;;  %v558_v38 = vsel %vm556_vm1, %v499_v35, 0  ;;  %v905_v39 = vpop.f32.mrb[3].mxu1 }
 0x183   : > { %912 = vmatprep.subr.bf16.mxu1 %v1321_v3 }
 0x189   : > { %909 = vmatmul.mubr.bf16.vlgmr.msra.gmra.mrb[4].mxu1 %v497_v33 }
 0x18a   : > { %914 = vmatprep.mubr.msk.bf16.mxu1 %vm1322_vm0, %v1321_v3  ;;  %913 = vmatpush3.bf16.msra.mxu1 %v558_v38 }
 0x25c   : > { %v534_v40 = vpop.f32.mrb[4].mxu1 }
 0x25d   : > { %v910_v41 = vpop.f32.mrb[5].mxu1  ;;  %v541_v42 = vsel %vm540_vm2, %v534_v40, -inf }
 0x25e   : > { %542 = vmax.xlane.f32.xlu0 %v541_v42  ;;  %v537_v43 = vpop.f32.mrb[6].mxu1 }
 0x25f   : > { %v911_v44 = vpop.f32.mrb[7].mxu1 }
 0x2eb   : > { %v543_v45 = vpop.xlane.xlu0 %542 }
 0x2ec   : > { %v544_v46 = vsub.f32 %v534_v40, %v543_v45 }
 0x2ee   : > { %v545_v47 = vmul.f32 1.442695, %v544_v46 }
 0x2f0   : > { %1095 = vpow2.f32 %v545_v47 }
 0x2fa   : > { %v1096_v48 = vpop.eup %1095 }
 0x2fb   : > { %v547_v49 = vsel %vm540_vm2, %v1096_v48, 0.0 }
 0x2fc   : > { %548 = vadd.xlane.f32.xlu0 %v547_v49 }
 0x389   : > { %v549_v57 = vpop.xlane.xlu0 %548 }
 0x38a   : > { %1097 = vrcp.f32 %v549_v57 }
 0x394   : > { %v1098_v58 = vpop.eup %1097 }
 0x395   : > { %v551_v59 = vmul.f32 %v1098_v58, %v1096_v48 }
 0x397   : > { %v552_v60 = vpack.c.bf16 %v551_v59, %v551_v59 }
 0x399   : > { %915 = vmatmul.mubr.msk.bf16.vlgmr.msra.gmra.mrb[8].mxu1 %vm540_vm2, %v552_v60 }
 0x46c   : > { %v594_v62 = vpop.f32.mrb[8].mxu1 }
 0x46d   : > { %v600_v63 = vpack.c.bf16 %v594_v62, %v594_v62  ;;  %v916_v0 = vpop.f32.mrb[9].mxu1 }
 0x46e   : > { %v597_v1 = vpop.f32.mrb[10].mxu1 }
 0x46f   : > { %v917_v2 = vpop.f32.mrb[11].mxu1  ;;  %935 = vmatmul.mubr.bf16.vlgmr.msra.gmra.mrb[4].mxu0 %v600_v63 }
 0x542   : > { %v683_v3 = vpop.f32.mrb[4].mxu0 }
 0x543   : > { %v689_v4 = vadd.f32 %v683_v3, %v1589_v23  ;;  %v936_v5 = vpop.f32.mrb[5].mxu0 }
 0x544   : > { %v686_v6 = vpop.f32.mrb[6].mxu0 }
 0x545   : > { %690 = vst [vmem:[%s1548_s27] sm:$0xff] %v689_v4  ;;  %v937_v7 = vpop.f32.mrb[7].mxu0 }
 0x546   : > { %1196 = shalt.err (!%p1193_p7)
}
 0x547   : > { %s1197_s30 = scalar_lea.hbm %s1630_s9, 128  ;;  %s1201_s15 = scalar_lea.hbm %s1698_s3, 256 }
 0x548   : > { %p1198_p13 = scmp.ne.s32.totalorder %s1630_s9, %s1197_s30  ;;  %p1202_p3 = scmp.lt.u32.totalorder %s1630_s9, %s1698_s3 }
 0x549   : > { %p1203_p6 = scmp.lt.u32.totalorder %s1201_s15, %s1197_s30  ;;  %p1205_p8 = scmp.lt.u32.totalorder %s1197_s30, %s1630_s9 }
 0x54a   : > { %p1199_p2 = pnand %p1198_p13, %p1717_p4 }
 0x54b   : > { %p1204_p9 = por %p1203_p6, %p1202_p3 }
 0x54c   : > { %p1200_p0 = pneg %p1199_p2 }
 0x54d   : > { %p1206_p5 = por %p1205_p8, %p1204_p9 }
 0x54f   : > { %p1207_p12 = pnand %p1206_p5, %p1200_p0 }
 0x551   : > { %1210 = shalt.err (!%p1207_p12)
}
 0x552   : > { %945 = dma.vmem_to_hbm [thread:$0]  (%p1717_p4), %s1632_s21, 128, %s1630_s9, %s692_s19  }
 0x553 PF: > { %p959_p1 = scmp.ge.s32.totalorder %s1311_s22, 2  ;;  %s717_s28 = sand.u32 1, %s1271_s12  }
 0x554   : > { %p1718_p10 = scmp.ne.s32.totalorder %s1712_s10, 0  ;;  %s718_s29 = scalar_lea.sflag [#allocation4], %s717_s28 }
 0x556   : > { %p955_p11 = pnand %p959_p1, %p1718_p10 }
 0x558   : > { %1266 = dma.done.wait (!%p955_p11), %s718_s29, 128  }
 0x559   : > { %1268 = vsyncadd (!%p955_p11), %s718_s29, 4294967168  ;;  %s22_s22 = sadd.s32 1, %s1311_s22   ;;  %s1719_s8 = sld [smem:[#allocation20_spill]] }
 0x55a   : > { %p19_p7 = scmp.ge.s32.totalorder %s22_s22, 8   ;;  %s1720_s19 = sld [smem:[#allocation17_spill]] }
 0x55b   : > { %s1721_s11 = sld [smem:[#allocation18_spill]]  ;;  %s1722_s21 = sld [smem:[#allocation19_spill]] }
 0x55c   : > { %s1723_s12 = smov %s1275_s13  ;;  %s1724_s13 = smov %s1279_s14 }
 0x55d   : > { %s1725_s14 = smov %s1430_s7  ;;  %s1726_s15 = smov %s1287_s16 }
 0x55e   : > { %s1727_s16 = smov %s1291_s17  ;;  %s1729_s18 = smov %s1303_s20 }
 0x55f   : > { %s1728_s17 = smov %s1719_s8  ;;  %21 = sbr.rel (!%p19_p7) target bundleno = 13 (0xd), region = 96 }
 0x561   : > { %s1730_s20 = smov %s1721_s11 }
 0x566   :  { %723 = vsyncpa [#allocation3], 1 }
 0x567   :  { %725 = vsyncpa [#allocation3 + $0x1], 1 }
 0x568   :  { %726 = vsyncpa [#allocation6], 1 }
 0x569   :  { %728 = vsyncpa [#allocation6 + $0x1], 1 }
 0x56a   :  { %729 = vsyncpa [#allocation4], 1 }
 0x56b   :  { %731 = vsyncpa [#allocation4 + $0x1], 1 }

</bundles_post_ra>
